<compile_context>
chip_gen: v5e
topology: v5e:2x2
jax: 0.10.0
libtpu: 0.0.40
codegen_flags: <defaults>
</compile_context>

<pallas_src>
import functools
from typing import NamedTuple, Optional

import jax
import jax.numpy as jnp
from jax import lax
from jax.experimental import pallas as pl
from jax.experimental.pallas import tpu as pltpu


_INV_SQRT2 = 0.7071067811865476


# --------------------------------------------------------------------------
# Kernels
# --------------------------------------------------------------------------

def _mlp_kernel_direct(x_ref, w1_ref, b1_ref, w2_ref, b2_ref, o_ref):
    """f32 output: accumulate straight into the resident output block."""
    j = pl.program_id(1)

    h = jnp.dot(x_ref[...], w1_ref[...], preferred_element_type=jnp.float32)
    h = h + b1_ref[...].astype(jnp.float32)
    # Exact GELU (nn.GELU() default): 0.5 * h * (1 + erf(h / sqrt(2)))
    h = 0.5 * h * (1.0 + lax.erf(h * _INV_SQRT2))
    contrib = jnp.dot(
        h.astype(w2_ref.dtype), w2_ref[...], preferred_element_type=jnp.float32
    )

    @pl.when(j == 0)
    def _init():
        o_ref[...] = contrib + b2_ref[...].astype(jnp.float32)

    @pl.when(j > 0)
    def _accum():
        o_ref[...] += contrib


def _mlp_kernel_scratch(x_ref, w1_ref, b1_ref, w2_ref, b2_ref, o_ref, acc_ref):
    """Non-f32 output: accumulate in an f32 VMEM scratch, cast once at the end."""
    j = pl.program_id(1)

    @pl.when(j == 0)
    def _init():
        acc_ref[...] = jnp.zeros_like(acc_ref)

    h = jnp.dot(x_ref[...], w1_ref[...], preferred_element_type=jnp.float32)
    h = h + b1_ref[...].astype(jnp.float32)
    h = 0.5 * h * (1.0 + lax.erf(h * _INV_SQRT2))
    acc_ref[...] += jnp.dot(
        h.astype(w2_ref.dtype), w2_ref[...], preferred_element_type=jnp.float32
    )

    @pl.when(j == pl.num_programs(1) - 1)
    def _finalize():
        o_ref[...] = (acc_ref[...] + b2_ref[...].astype(jnp.float32)).astype(
            o_ref.dtype
        )


# --------------------------------------------------------------------------
# Tiling plan (generation-aware, pure Python)
# --------------------------------------------------------------------------

def _round_up(a, b):
    return ((a + b - 1) // b) * b


def _sublane_multiple(dtype) -> int:
    # Rows per packed sublane tile: 8 for 32-bit, 16 for bf16/f16, 32 for 8-bit.
    return max(8, 32 // jnp.dtype(dtype).itemsize)


def _vmem_capacity_bytes() -> int:
    try:
        return int(pltpu.get_tpu_info().vmem_capacity_bytes)
    except Exception:
        return 64 << 20  # conservative (v7x per-TC)


def _num_tensorcores_per_chip() -> int:
    try:
        kind = (getattr(jax.devices()[0], "device_kind", "") or "").lower()
        if "v7" in kind:
            return 2
    except Exception:
        pass
    return 1


def _pick_hidden_tile(H, target):
    """Largest 128-multiple divisor of H_pad <= target; H_pad = ceil(H/128)*128."""
    target = max(128, (int(target) // 128) * 128)
    h_pad = _round_up(H, 128)
    if h_pad <= target:
        return h_pad, h_pad
    d = target
    while d >= 128:
        if h_pad % d == 0:
            return d, h_pad
        d -= 128
    return 128, h_pad  # unreachable: 128 always divides h_pad


def _footprint_bytes(tm, C, th, xb, wb, bb, ob, use_scratch):
    fp = 2 * tm * C * xb           # x row-tiles (double-buffered)
    fp += 2 * tm * C * ob          # output tiles
    fp += 2 * C * th * wb          # w1 hidden-tiles
    fp += 2 * th * C * wb          # w2 hidden-tiles
    fp += 2 * (th + C) * bb        # biases
    fp += tm * th * 4              # live f32 hidden intermediate
    if use_scratch:
        fp += tm * C * 4           # f32 accumulator scratch
    return fp


class _Plan(NamedTuple):
    tm: int
    th: int
    m_pad: int
    h_pad: int
    use_scratch: bool
    vmem_limit: int


def _make_plan(M, C, H, x_dtype, w_dtype, b_dtype,
               tm_req: Optional[int], th_req: Optional[int]) -> _Plan:
    xb = jnp.dtype(x_dtype).itemsize
    wb = jnp.dtype(w_dtype).itemsize
    bb = jnp.dtype(b_dtype).itemsize
    ob = xb  # output keeps x's dtype
    sub = _sublane_multiple(x_dtype)
    use_scratch = jnp.dtype(x_dtype) != jnp.dtype(jnp.float32)

    vmem_cap = _vmem_capacity_bytes()
    budget = max(vmem_cap - (8 << 20), 8 << 20)  # leave headroom for compiler

    th, h_pad = _pick_hidden_tile(H, th_req if th_req else 512)

    m_ceil = _round_up(M, sub)
    candidates = [int(tm_req)] if tm_req else [1024, 768, 512, 384, 256, 128, 64, 32, 16, 8]
    tm = None
    for cand in candidates:
        t = max(sub, min(_round_up(cand, sub), m_ceil))
        if _footprint_bytes(t, C, th, xb, wb, bb, ob, use_scratch) <= budget:
            tm = t
            break
    if tm is None:
        tm = sub  # last resort: smallest legal tile

    # v7x megacore: make sure there are >= 2 row tiles so the ("parallel", ...)
    # axis actually shards across both TensorCores; skip for tiny/decode M
    # where the extra weight pass would cost more than it saves.
    if (_num_tensorcores_per_chip() >= 2
            and _round_up(M, tm) // tm < 2
            and M >= 2 * sub):
        tm = _round_up((M + 1) // 2, sub)

    m_pad = _round_up(M, tm)
    fp = _footprint_bytes(tm, C, th, xb, wb, bb, ob, use_scratch)
    vmem_limit = int(min(max(fp + (4 << 20), 16 << 20),
                         max(vmem_cap - (2 << 20), 16 << 20)))

    return _Plan(tm=int(tm), th=int(th), m_pad=int(m_pad), h_pad=int(h_pad),
                 use_scratch=bool(use_scratch), vmem_limit=vmem_limit)


# --------------------------------------------------------------------------
# pallas_call wrapper
# --------------------------------------------------------------------------

@functools.partial(jax.jit, static_argnames=("plan",))
def _mlp_pallas_impl(x, w1, b1, w2, b2, *, plan: _Plan):
    B, T, C = x.shape
    H = w1.shape[1]
    M = B * T
    tm, th, m_pad, h_pad = plan.tm, plan.th, plan.m_pad, plan.h_pad

    x2 = x.reshape(M, C)
    if m_pad != M:
        x2 = jnp.pad(x2, ((0, m_pad - M), (0, 0)))
    if h_pad != H:
        # Zero-padded hidden columns are exact: gelu(0 + 0) = 0 and the
        # matching zero rows of w2 contribute nothing.
        w1 = jnp.pad(w1, ((0, 0), (0, h_pad - H)))
        b1 = jnp.pad(b1, ((0, h_pad - H),))
        w2 = jnp.pad(w2, ((0, h_pad - H), (0, 0)))
    b1_2 = b1.reshape(1, h_pad)
    b2_2 = b2.reshape(1, C)

    grid = (m_pad // tm, h_pad // th)

    xb = x.dtype.itemsize
    wb = w1.dtype.itemsize
    # Honest traffic estimate: w1/w2 are re-streamed once per row tile.
    bytes_accessed = (
        m_pad * C * xb                       # x read
        + m_pad * C * xb                     # out write
        + grid[0] * 2 * C * h_pad * wb       # w1 + w2 per row tile
        + grid[0] * (h_pad + C) * b1.dtype.itemsize
    )
    cost = pl.CostEstimate(
        flops=4 * m_pad * C * h_pad,         # two matmuls, 2*M*C*H each
        transcendentals=m_pad * h_pad,       # erf per hidden activation
        bytes_accessed=int(bytes_accessed),
    )

    in_specs = [
        pl.BlockSpec((tm, C), lambda i, j: (i, 0)),   # x row-tile
        pl.BlockSpec((C, th), lambda i, j: (0, j)),   # w1 hidden-tile
        pl.BlockSpec((1, th), lambda i, j: (0, j)),   # b1 hidden-tile
        pl.BlockSpec((th, C), lambda i, j: (j, 0)),   # w2 hidden-tile
        pl.BlockSpec((1, C), lambda i, j: (0, 0)),    # b2
    ]
    out_spec = pl.BlockSpec((tm, C), lambda i, j: (i, 0))

    if plan.use_scratch:
        kernel = _mlp_kernel_scratch
        scratch = [pltpu.VMEM((tm, C), jnp.float32)]
    else:
        kernel = _mlp_kernel_direct
        scratch = []

    out = pl.pallas_call(
        kernel,
        out_shape=jax.ShapeDtypeStruct((m_pad, C), x.dtype),
        grid_spec=pltpu.PrefetchScalarGridSpec(
            num_scalar_prefetch=0,
            grid=grid,
            in_specs=in_specs,
            out_specs=out_spec,
            scratch_shapes=scratch,
        ),
        compiler_params=pltpu.CompilerParams(
            dimension_semantics=("parallel", "arbitrary"),
            vmem_limit_bytes=plan.vmem_limit,
        ),
        cost_estimate=cost,
    )(x2, w1, b1_2, w2, b2_2)

    return out[:M].reshape(B, T, C)


def mlp_pallas(x, w1, b1, w2, b2, *, tm=None, th=None):
    """x: (B, T, C). w1: (C, 4C), b1: (4C,), w2: (4C, C), b2: (C,).

    Weights/activations may be f32 or bf16; matmuls accumulate in f32.
    Weights are stored (in_features, out_features) = transpose of torch.
    """
    B, T, C = x.shape
    H = w1.shape[1]
    M = B * T
    plan = _make_plan(M, C, H, x.dtype, w1.dtype, b1.dtype, tm, th)
    return _mlp_pallas_impl(x, w1, b1, w2, b2, plan=plan)


# --------------------------------------------------------------------------
# Reference + test
# --------------------------------------------------------------------------

def _reference_mlp(x, w1, b1, w2, b2):
    x = x.astype(jnp.float32)
    w1 = w1.astype(jnp.float32)
    b1 = b1.astype(jnp.float32)
    w2 = w2.astype(jnp.float32)
    b2 = b2.astype(jnp.float32)
    h = jnp.dot(x, w1) + b1
    h = 0.5 * h * (1.0 + lax.erf(h * _INV_SQRT2))
    return jnp.dot(h, w2) + b2


if __name__ == "__main__":
    # config: n_embd=32, bias=True, dropout=0.0; input (B=2, T=8, C=32)
    B, T, C = 2, 8, 32
    H = 4 * C

    key = jax.random.PRNGKey(0)
    kx, k1, kb1, k2, kb2 = jax.random.split(key, 5)

    x = jax.random.normal(kx, (B, T, C), dtype=jnp.float32)
    # PyTorch nn.Linear default init: U(-1/sqrt(fan_in), 1/sqrt(fan_in));
    # weights stored here as (in, out) = transpose of torch's (out, in).
    bound1 = 1.0 / jnp.sqrt(jnp.float32(C))
    w1 = jax.random.uniform(k1, (C, H), jnp.float32, -bound1, bound1)
    b1 = jax.random.uniform(kb1, (H,), jnp.float32, -bound1, bound1)
    bound2 = 1.0 / jnp.sqrt(jnp.float32(H))
    w2 = jax.random.uniform(k2, (H, C), jnp.float32, -bound2, bound2)
    b2 = jax.random.uniform(kb2, (C,), jnp.float32, -bound2, bound2)

    # f32 path: must match the exact reference tightly.
    out = mlp_pallas(x, w1, b1, w2, b2)
    jax.block_until_ready(out)
    ref = _reference_mlp(x, w1, b1, w2, b2)
    assert out.shape == (B, T, C)
    assert jnp.allclose(out, ref, atol=1e-5, rtol=1e-5), "f32 mismatch vs reference"

    # bf16 path (the fast MXU path): loose tolerance vs f32 reference on the
    # same (bf16-rounded) operands.
    xb = x.astype(jnp.bfloat16)
    w1b = w1.astype(jnp.bfloat16)
    b1b = b1.astype(jnp.bfloat16)
    w2b = w2.astype(jnp.bfloat16)
    b2b = b2.astype(jnp.bfloat16)
    out_b = mlp_pallas(xb, w1b, b1b, w2b, b2b)
    jax.block_until_ready(out_b)
    ref_b = _reference_mlp(xb, w1b, b1b, w2b, b2b)
    assert jnp.allclose(
        out_b.astype(jnp.float32), ref_b, atol=5e-2, rtol=5e-2
    ), "bf16 mismatch vs reference"

    print("KERNEL_OK")
</pallas_src>

<mosaic_0001>
module attributes {stable_mosaic.version = 11 : i64} {
  func.func @_mlp_kernel_direct(%arg0: i32, %arg1: i32, %arg2: memref<16x32xf32, #tpu.memory_space<vmem>>, %arg3: memref<32x128xf32, #tpu.memory_space<vmem>>, %arg4: memref<1x128xf32, #tpu.memory_space<vmem>>, %arg5: memref<128x32xf32, #tpu.memory_space<vmem>>, %arg6: memref<1x32xf32, #tpu.memory_space<vmem>>, %arg7: memref<16x32xf32, #tpu.memory_space<vmem>>) attributes {dimension_semantics = [#tpu.dimension_semantics<parallel>, #tpu.dimension_semantics<arbitrary>], iteration_bounds = array<i64: 1, 1>, scalar_prefetch = 0 : i64, scratch_operands = 0 : i64, tpu.core_type = #tpu.core_type<tc>, window_params = [{transform_indices = @transform_0, window_bounds = array<i64: 16, 32>}, {transform_indices = @transform_1, window_bounds = array<i64: 32, 128>}, {transform_indices = @transform_2, window_bounds = array<i64: 1, 128>}, {transform_indices = @transform_3, window_bounds = array<i64: 128, 32>}, {pipeline_mode = #tpu.pipeline_mode<synchronous>, transform_indices = @transform_4, window_bounds = array<i64: 1, 32>}, {transform_indices = @transform_5, window_bounds = array<i64: 16, 32>}]} {
    %c0 = arith.constant 0 : index
    %c0_0 = arith.constant 0 : index
    %0 = vector.load %arg2[%c0, %c0_0] : memref<16x32xf32, #tpu.memory_space<vmem>>, vector<16x32xf32>
    %c0_1 = arith.constant 0 : index
    %c0_2 = arith.constant 0 : index
    %1 = vector.load %arg3[%c0_1, %c0_2] : memref<32x128xf32, #tpu.memory_space<vmem>>, vector<32x128xf32>
    %cst = arith.constant dense<0.000000e+00> : vector<16x128xf32>
    %2 = tpu.matmul %0, %1, %cst {dimension_numbers = #tpu.dot_dimension_numbers<[1], [0], [0], [1], [0, 0, 1, 1], [], []>} : vector<16x32xf32>, vector<32x128xf32>, vector<16x128xf32> -> vector<16x128xf32>
    %c0_3 = arith.constant 0 : index
    %c0_4 = arith.constant 0 : index
    %3 = vector.load %arg4[%c0_3, %c0_4] : memref<1x128xf32, #tpu.memory_space<vmem>>, vector<1x128xf32>
    %4 = vector.broadcast %3 : vector<1x128xf32> to vector<16x128xf32>
    %5 = arith.addf %2, %4 : vector<16x128xf32>
    %cst_5 = arith.constant 5.000000e-01 : f32
    %6 = vector.broadcast %cst_5 : f32 to vector<16x128xf32>
    %7 = arith.mulf %6, %5 : vector<16x128xf32>
    %cst_6 = arith.constant 0.707106769 : f32
    %8 = vector.broadcast %cst_6 : f32 to vector<16x128xf32>
    %9 = arith.mulf %5, %8 : vector<16x128xf32>
    %10 = math.erf %9 : vector<16x128xf32>
    %cst_7 = arith.constant 1.000000e+00 : f32
    %11 = vector.broadcast %cst_7 : f32 to vector<16x128xf32>
    %12 = arith.addf %11, %10 : vector<16x128xf32>
    %13 = arith.mulf %7, %12 : vector<16x128xf32>
    %c0_8 = arith.constant 0 : index
    %c0_9 = arith.constant 0 : index
    %14 = vector.load %arg5[%c0_8, %c0_9] : memref<128x32xf32, #tpu.memory_space<vmem>>, vector<128x32xf32>
    %cst_10 = arith.constant dense<0.000000e+00> : vector<16x32xf32>
    %15 = tpu.matmul %13, %14, %cst_10 {dimension_numbers = #tpu.dot_dimension_numbers<[1], [0], [0], [1], [0, 0, 1, 1], [], []>} : vector<16x128xf32>, vector<128x32xf32>, vector<16x32xf32> -> vector<16x32xf32>
    %c0_i32 = arith.constant 0 : i32
    %16 = arith.cmpi eq, %arg1, %c0_i32 : i32
    %17 = arith.extui %16 : i1 to i32
    %c0_i32_11 = arith.constant 0 : i32
    %18 = arith.cmpi ne, %17, %c0_i32_11 : i32
    scf.if %18 {
      %c0_14 = arith.constant 0 : index
      %c0_15 = arith.constant 0 : index
      %22 = vector.load %arg6[%c0_14, %c0_15] : memref<1x32xf32, #tpu.memory_space<vmem>>, vector<1x32xf32>
      %23 = vector.broadcast %22 : vector<1x32xf32> to vector<16x32xf32>
      %24 = arith.addf %15, %23 : vector<16x32xf32>
      %c0_16 = arith.constant 0 : index
      %c0_17 = arith.constant 0 : index
      %25 = vector.load %arg7[%c0_16, %c0_17] : memref<16x32xf32, #tpu.memory_space<vmem>>, vector<16x32xf32>
      tpu.vector_store %arg7[%c0_16, %c0_17], %24 {strides = array<i32>} : memref<16x32xf32, #tpu.memory_space<vmem>>, vector<16x32xf32>,
    } else {
    }
    %c0_i32_12 = arith.constant 0 : i32
    %19 = arith.cmpi sgt, %arg1, %c0_i32_12 : i32
    %20 = arith.extui %19 : i1 to i32
    %c0_i32_13 = arith.constant 0 : i32
    %21 = arith.cmpi ne, %20, %c0_i32_13 : i32
    scf.if %21 {
      %c0_14 = arith.constant 0 : index
      %c0_15 = arith.constant 0 : index
      %22 = vector.load %arg7[%c0_14, %c0_15] : memref<16x32xf32, #tpu.memory_space<vmem>>, vector<16x32xf32>
      %23 = arith.addf %22, %15 : vector<16x32xf32>
      %c0_16 = arith.constant 0 : index
      %c0_17 = arith.constant 0 : index
      %24 = vector.load %arg7[%c0_16, %c0_17] : memref<16x32xf32, #tpu.memory_space<vmem>>, vector<16x32xf32>
      tpu.vector_store %arg7[%c0_16, %c0_17], %23 {strides = array<i32>} : memref<16x32xf32, #tpu.memory_space<vmem>>, vector<16x32xf32>,
    } else {
    }
    return
  }
  func.func @transform_0(%arg0: i32, %arg1: i32) -> (i32, i32) {
    %c0_i32 = arith.constant 0 : i32
    %c0_i32_0 = arith.constant 0 : i32
    return %arg0, %c0_i32 : i32, i32
  }
  func.func @transform_1(%arg0: i32, %arg1: i32) -> (i32, i32) {
    %c0_i32 = arith.constant 0 : i32
    %c0_i32_0 = arith.constant 0 : i32
    return %c0_i32, %arg1 : i32, i32
  }
  func.func @transform_2(%arg0: i32, %arg1: i32) -> (i32, i32) {
    %c0_i32 = arith.constant 0 : i32
    %c0_i32_0 = arith.constant 0 : i32
    return %c0_i32, %arg1 : i32, i32
  }
  func.func @transform_3(%arg0: i32, %arg1: i32) -> (i32, i32) {
    %c0_i32 = arith.constant 0 : i32
    %c0_i32_0 = arith.constant 0 : i32
    return %arg1, %c0_i32 : i32, i32
  }
  func.func @transform_4(%arg0: i32, %arg1: i32) -> (i32, i32) {
    %c0_i32 = arith.constant 0 : i32
    %c0_i32_0 = arith.constant 0 : i32
    %c0_i32_1 = arith.constant 0 : i32
    return %c0_i32, %c0_i32_0 : i32, i32
  }
  func.func @transform_5(%arg0: i32, %arg1: i32) -> (i32, i32) {
    %c0_i32 = arith.constant 0 : i32
    %c0_i32_0 = arith.constant 0 : i32
    return %arg0, %c0_i32 : i32, i32
  }
}

</mosaic_0001>

<bundles_post_ra>
// kernel: _mlp_pallas_impl.1
= control target key start
LH: loop header
LB: loop body
LE: loop exit
PB: predicated region body
PF: predicated region fallthrough
CT: control target
= control target key end

     0   :  { %s425_s0 = inlined_call_operand.vmem [shape: f32[16,32], index: 0, kind: input, shape index: {}]   ;;  %s426_s1 = inlined_call_operand.vmem [shape: f32[32,128], index: 1, kind: input, shape index: {}]   ;;  %s427_s2 = inlined_call_operand.vmem [shape: f32[1,128], index: 2, kind: input, shape index: {}]   ;;  %s428_s3 = inlined_call_operand.vmem [shape: f32[128,32], index: 3, kind: input, shape index: {}]   ;;  %s429_s4 = inlined_call_operand.vmem [shape: f32[1,32], index: 4, kind: input, shape index: {}]   ;;  %s430_s5 = inlined_call_operand.hbm [shape: f32[16,32], index: 5, kind: output, shape index: {}]  }
   0x1   :  { %v26_v0 = vld [vmem:[%s426_s1 + $0x18] sm:$0xff]  ;;  %v25_v1 = vld [vmem:[%s426_s1 + $0x10] sm:$0xff]  ;;  %v24_v2 = vld [vmem:[%s426_s1 + $0x8] sm:$0xff] }
   0x2   :  { %50 = vmatpush.msra.mxu0 %v26_v0 }
   0x4   :  { %51 = vmatpush.msra.mxu0 %v25_v1 }
   0x5   :  { %10 = vsyncpa [#allocation3], 0  ;;  %v23_v3 = vld [vmem:[%s426_s1] sm:$0xff]  ;;  %vm31_vm0 = vcmask 261120   ;;  %v22_v5 = vld [vmem:[%s425_s0 + $0x8] sm:$0xff]  ;;  %s283_s10 = smov [#allocation2]  }
   0x6   :  { %52 = vmatpush.msra.mxu0 %v24_v2  ;;  %v21_v4 = vld [vmem:[%s425_s0] sm:$0xff]  ;;  %v164_v6 = vld [vmem:[%s428_s3 + $0x78] sm:$0xff]  ;;  %v163_v7 = vld [vmem:[%s428_s3 + $0x70] sm:$0xff]  ;;  %s214_s11 = sshll.u32 %s283_s10, 4  ;;  %s216_s14 = sshll.u32 %s430_s5, 4  ;;  %s215_s11 = int_to_ptr.vmem [resolvable:$true] %s214_s11  ;;  %s217_s14 = int_to_ptr.hbm [resolvable:$true] %s216_s14 }
   0x7   :  { %165 = vmatpush.msra.mxu1 %v164_v6  ;;  %232 = vmatpush.msra.mxu2 %v164_v6  ;;  %v162_v8 = vld [vmem:[%s428_s3 + $0x68] sm:$0xff]  ;;  %v161_v9 = vld [vmem:[%s428_s3 + $0x60] sm:$0xff]  ;;  %v160_v11 = vld [vmem:[%s428_s3 + $0x58] sm:$0xff]  ;;  %s284_s15 = smov 128   ;;  %s285_s16 = smov 8  }
   0x8   :  { %53 = vmatpush.msra.mxu0 %v23_v3  ;;  %v251_v10 = vld [vmem:[%s427_s2] ss:$0 sm:$0xff]  ;;  %v159_v13 = vld [vmem:[%s428_s3 + $0x50] sm:$0xff]  ;;  %v158_v15 = vld [vmem:[%s428_s3 + $0x48] sm:$0xff] }
   0x9   :  { %228 = vmatmul.msk.f32.vlgmr.msra.gmra.mxu0 %vm31_vm0, %v21_v4  ;;  %166 = vmatpush.msra.mxu1 %v163_v7  ;;  %v157_v17 = vld [vmem:[%s428_s3 + $0x40] sm:$0xff]  ;;  %v156_v19 = vld [vmem:[%s428_s3 + $0x38] sm:$0xff]  ;;  %v155_v20 = vld [vmem:[%s428_s3 + $0x30] sm:$0xff] }
   0xa   :  { %233 = vmatpush.msra.mxu2 %v163_v7  ;;  %v154_v23 = vld [vmem:[%s428_s3 + $0x28] sm:$0xff]  ;;  %v153_v27 = vld [vmem:[%s428_s3 + $0x20] sm:$0xff]  ;;  %v152_v30 = vld [vmem:[%s428_s3 + $0x18] sm:$0xff] }
   0xb   :  { %167 = vmatpush.msra.mxu1 %v162_v8  ;;  %v151_v34 = vld [vmem:[%s428_s3 + $0x10] sm:$0xff]  ;;  %v150_v37 = vld [vmem:[%s428_s3 + $0x8] sm:$0xff]  ;;  %v149_v42 = vld [vmem:[%s428_s3] sm:$0xff] }
   0xc   :  { %234 = vmatpush.msra.mxu2 %v162_v8 }
   0xd   :  { %168 = vmatpush.msra.mxu1 %v161_v9 }
   0xe   :  { %235 = vmatpush.msra.mxu2 %v161_v9 }
   0xf   :  { %169 = vmatpush.msra.mxu1 %v160_v11 }
  0x10   :  { %236 = vmatpush.msra.mxu2 %v160_v11 }
  0x11   :  { %229 = vmatmul.msk.f32.gmra.mxu0 %vm31_vm0, %v22_v5  ;;  %170 = vmatpush.msra.mxu1 %v159_v13 }
  0x12   :  { %237 = vmatpush.msra.mxu2 %v159_v13 }
  0x13   :  { %171 = vmatpush.msra.mxu1 %v158_v15 }
  0x14   :  { %238 = vmatpush.msra.mxu2 %v158_v15 }
  0x15   :  { %172 = vmatpush.msra.mxu1 %v157_v17 }
  0x16   :  { %239 = vmatpush.msra.mxu2 %v157_v17 }
  0x17   :  { %173 = vmatpush.msra.mxu1 %v156_v19 }
  0x18   :  { %240 = vmatpush.msra.mxu2 %v156_v19 }
  0x19   :  { %174 = vmatpush.msra.mxu1 %v155_v20 }
  0x1a   :  { %241 = vmatpush.msra.mxu2 %v155_v20 }
  0x1b   :  { %175 = vmatpush.msra.mxu1 %v154_v23 }
  0x1c   :  { %242 = vmatpush.msra.mxu2 %v154_v23 }
  0x1d   :  { %176 = vmatpush.msra.mxu1 %v153_v27 }
  0x1e   :  { %243 = vmatpush.msra.mxu2 %v153_v27 }
  0x1f   :  { %177 = vmatpush.msra.mxu1 %v152_v30 }
  0x20   :  { %244 = vmatpush.msra.mxu2 %v152_v30 }
  0x21   :  { %178 = vmatpush.msra.mxu1 %v151_v34 }
  0x22   :  { %245 = vmatpush.msra.mxu2 %v151_v34 }
  0x23   :  { %179 = vmatpush.msra.mxu1 %v150_v37 }
  0x24   :  { %246 = vmatpush.msra.mxu2 %v150_v37 }
  0x25   :  { %180 = vmatpush.msra.mxu1 %v149_v42 }
  0x26   :  { %247 = vmatpush.msra.mxu2 %v149_v42 }
  0x86   :  { %v55_v12 = vpop.f32.mrf.mxu0 }
  0x87   :  { %v357_v14 = vadd.f32 %v251_v10, %v55_v12 }
  0x89   :  { %v363_v16 = vmul.f32 0.70710677, %v357_v14 }
  0x8b   :  { %v65_v18 = vmul.f32 %v363_v16, %v363_v16 }
  0x8d   :  { %v376_v21 = vmin.f32 %v65_v18, 16.0 }
  0x8e   :  { %v58_v22 = vpop.f32.mrf.mxu0 }
  0x8f   :  { %v67_v24 = vmul.f32 2.1237322e-06, %v376_v21  ;;  %v382_v25 = vadd.f32 %v251_v10, %v58_v22  ;;  %v78_v26 = vmul.f32 3.8918573e-05, %v376_v21 }
  0x91   :  { %v68_v28 = vadd.f32 0.00028619796, %v67_v24  ;;  %v389_v29 = vmul.f32 0.70710677, %v382_v25  ;;  %v79_v31 = vadd.f32 0.001143296, %v78_v26 }
  0x93   :  { %v69_v32 = vmul.f32 %v68_v28, %v376_v21  ;;  %v105_v33 = vmul.f32 %v389_v29, %v389_v29  ;;  %v80_v35 = vmul.f32 %v79_v31, %v376_v21 }
  0x95   :  { %v106_v36 = vmin.f32 %v105_v33, 16.0  ;;  %v81_v38 = vadd.f32 0.014752088, %v80_v35  ;;  %v70_v39 = vadd.f32 0.0036580483, %v69_v32  ;;  %v61_v33 = vmul.f32 0.5, %v357_v14 }
  0x96   :  { %v252_v14 = vld [vmem:[%s429_s4] ss:$0 sm:$0xff] }
  0x97   :  { %v107_v40 = vmul.f32 2.1237322e-06, %v106_v36  ;;  %v118_v41 = vmul.f32 3.8918573e-05, %v106_v36  ;;  %v82_v43 = vmul.f32 %v81_v38, %v376_v21  ;;  %v71_v47 = vmul.f32 %v70_v39, %v376_v21 }
  0x99   :  { %v108_v44 = vadd.f32 0.00028619796, %v107_v40  ;;  %v119_v45 = vadd.f32 0.001143296, %v118_v41  ;;  %v83_v46 = vadd.f32 0.112945676, %v82_v43 }
  0x9a   :  { %v72_v54 = vadd.f32 0.05243302, %v71_v47  ;;  %v62_v41 = vmul.f32 0.5, %v382_v25 }
  0x9b   :  { %v109_v48 = vmul.f32 %v108_v44, %v106_v36  ;;  %v120_v49 = vmul.f32 %v119_v45, %v106_v36  ;;  %v84_v50 = vmul.f32 %v83_v46, %v376_v21 }
  0x9c   :  { %v73_v60 = vmul.f32 %v72_v54, %v376_v21 }
  0x9d   :  { %v121_v51 = vadd.f32 0.014752088, %v120_v49  ;;  %v110_v52 = vadd.f32 0.0036580483, %v109_v48  ;;  %v85_v53 = vadd.f32 0.4994258, %v84_v50 }
  0x9e   :  { %v74_v0 = vadd.f32 0.18741608, %v73_v60 }
  0x9f   :  { %v122_v55 = vmul.f32 %v121_v51, %v106_v36  ;;  %v86_v56 = vmul.f32 %v85_v53, %v376_v21  ;;  %v111_v58 = vmul.f32 %v110_v52, %v106_v36 }
  0xa0   :  { %v75_v5 = vmul.f32 %v74_v0, %v376_v21 }
  0xa1   :  { %v123_v57 = vadd.f32 0.112945676, %v122_v55  ;;  %v87_v59 = vadd.f32 1.0, %v86_v56  ;;  %v112_v63 = vadd.f32 0.05243302, %v111_v58 }
  0xa2   :  { %v76_v10 = vadd.f32 1.1283791, %v75_v5 }
  0xa3   :  { %v124_v61 = vmul.f32 %v123_v57, %v106_v36  ;;  %253 = vrcp.f32 %v87_v59  ;;  %v113_v4 = vmul.f32 %v112_v63, %v106_v36  ;;  %v99_v9 = vand.u32 2147483648, %v87_v59 }
  0xa4   :  { %v97_v12 = vand.u32 2147483647, %v87_v59  ;;  %vm93_vm2 = vweird.f32 %v87_v59  ;;  %v77_v20 = vmul.f32 %v76_v10, %v363_v16 }
  0xa5   :  { %v125_v62 = vadd.f32 0.4994258, %v124_v61  ;;  %v114_v8 = vadd.f32 0.18741608, %v113_v4  ;;  %v100_v18 = vor.u32 1.1754944e-38, %v99_v9 }
  0xa6   :  { %vm98_vm4 = vcmp.eq.f32.partialorder %v97_v12, 8.507059e+37 }
  0xa7   :  { %v126_v1 = vmul.f32 %v125_v62, %v106_v36  ;;  %v115_v17 = vmul.f32 %v114_v8, %v106_v36 }
  0xa9   :  { %v127_v2 = vadd.f32 1.0, %v126_v1  ;;  %v254_v3 = vpop.eup %253  ;;  %v116_v27 = vadd.f32 1.1283791, %v115_v17 }
  0xaa   :  { %v89_v6 = vmul.f32 %v254_v3, %v87_v59  ;;  %vm94_vm1 = vweird.f32 %v254_v3 }
  0xab   :  { %255 = vrcp.f32 %v127_v2  ;;  %vm95_vm3 = vmor %vm93_vm2, %vm94_vm1  ;;  %v139_v26 = vand.u32 2147483648, %v127_v2  ;;  %v137_v30 = vand.u32 2147483647, %v127_v2  ;;  %vm133_vm6 = vweird.f32 %v127_v2 }
  0xac   :  { %v90_v7 = vsub.f32 1.0, %v89_v6  ;;  %v117_v16 = vmul.f32 %v116_v27, %v389_v29 }
  0xad   :  { %v140_v35 = vor.u32 1.1754944e-38, %v139_v26  ;;  %vm138_vm8 = vcmp.eq.f32.partialorder %v137_v30, 8.507059e+37 }
  0xae   :  { %v91_v11 = vmul.f32 %v254_v3, %v90_v7 }
  0xb0   :  { %v92_v15 = vadd.f32 %v254_v3, %v91_v11 }
  0xb1   :  { %v256_v13 = vpop.eup %255 }
  0xb2   :  { %v129_v19 = vmul.f32 %v256_v13, %v127_v2  ;;  %v96_v22 = vsel %vm95_vm3, %v254_v3, %v92_v15  ;;  %vm134_vm5 = vweird.f32 %v256_v13 }
  0xb3   :  { %v101_v21 = vsel %vm98_vm4, %v100_v18, %v96_v22  ;;  %vm135_vm7 = vmor %vm133_vm6, %vm134_vm5 }
  0xb4   :  { %v130_v23 = vsub.f32 1.0, %v129_v19  ;;  %v102_v24 = vmul.f32 %v101_v21, %v77_v20 }
  0xb6   :  { %v131_v28 = vmul.f32 %v256_v13, %v130_v23  ;;  %v230_v31 = vclamps-f32 %v102_v24, 1.0 }
  0xb8   :  { %v132_v32 = vadd.f32 %v256_v13, %v131_v28  ;;  %v145_v34 = vadd.f32 1.0, %v230_v31 }
  0xba   :  { %v136_v36 = vsel %vm135_vm7, %v256_v13, %v132_v32  ;;  %v147_v37 = vmul.f32 %v145_v34, %v61_v33 }
  0xbb   :  { %v141_v38 = vsel %vm138_vm8, %v140_v35, %v136_v36 }
  0xbc   :  { %v142_v39 = vmul.f32 %v141_v38, %v117_v16  ;;  %181 = vmatmul.f32.vlgmr.msra.gmra.mxu1 %v147_v37 }
  0xbe   :  { %v231_v40 = vclamps-f32 %v142_v39, 1.0 }
  0xc0   :  { %v146_v42 = vadd.f32 1.0, %v231_v40 }
  0xc2   :  { %v148_v43 = vmul.f32 %v146_v42, %v62_v41 }
  0xc4   :  { %184 = vmatmul.f32.vlgmr.msra.gmra.mxu2 %v148_v43 }
 0x139   :  { %v182_v44 = vpop.f32.mrf.mxu1 }
 0x13a   :  { %v196_v45 = vadd.f32 %v252_v14, %v182_v44 }
 0x13c   :  { %198 = vst.msk [vmem:[#allocation2] sm:$0xff] %vm31_vm0, %v196_v45 }
 0x147   :  { %v185_v29 = vpop.f32.mrf.mxu2 }
 0x148   :  { %v197_v25 = vadd.f32 %v252_v14, %v185_v29 }
 0x14a   :  { %199 = vst.msk [vmem:[#allocation2 + $0x8] sm:$0xff] %vm31_vm0, %v197_v25 }
 0x14b   :  { %222 = dma.vmem_to_hbm [thread:$0]  %s215_s11, 256, %s217_s14, [#allocation3], %s284_s15, %s284_s15, %s285_s16  }
 0x14c   :  { %281 = dma.done.wait [#allocation3], 256  }
 0x14d   :  { %282 = vsyncadd [#allocation3], 4294967040 }
 0x14e   :  { %227 = vsyncpa [#allocation3], 1 }

</bundles_post_ra>
